<compile_context>
chip_gen: v5e
topology: v5e:2x2
jax: 0.10.0
libtpu: 0.0.40
codegen_flags: <defaults>
</compile_context>

<pallas_src>
import math
import jax
import jax.numpy as jnp
from jax.experimental import pallas as pl
from jax.experimental.pallas import tpu as pltpu

LANE = 128      # vreg lane width
SUBLANE = 8     # vreg sublane count (f32)


def _round_up(x, m):
    return ((x + m - 1) // m) * m


def _cdiv(a, b):
    return -(-a // b)


# ----------------------------------------------------------------------------- kernel
def actor_kernel(x_ref,
                 w1_ref, b1_ref,
                 w2_ref, b2_ref,
                 w3_ref, b3_ref,
                 w4_ref, b4_ref,
                 o_ref):
    # Fully fused MLP forward on one (TILE_B, in_dim) batch tile; weights VMEM-resident.
    # Matmul operands in bf16 (MXU-native), accumulation + elementwise in f32.
    x = x_ref[...].astype(jnp.bfloat16)

    h = jnp.dot(x, w1_ref[...], preferred_element_type=jnp.float32) + b1_ref[...]
    h = jnp.maximum(h, 0.0)

    h = jnp.dot(h.astype(jnp.bfloat16), w2_ref[...],
                preferred_element_type=jnp.float32) + b2_ref[...]
    h = jnp.maximum(h, 0.0)

    h = jnp.dot(h.astype(jnp.bfloat16), w3_ref[...],
                preferred_element_type=jnp.float32) + b3_ref[...]
    h = jnp.maximum(h, 0.0)

    h = jnp.dot(h.astype(jnp.bfloat16), w4_ref[...],
                preferred_element_type=jnp.float32) + b4_ref[...]
    o_ref[...] = jnp.tanh(h)


# ----------------------------------------------------------------------------- wrapper
def prepare_params(params):
    """One-time parameter prep (do NOT call per forward):

    * weights are stored transposed vs PyTorch, i.e. (in_features, out_features)
    * only the FINAL layer's output dim is zero-padded to a multiple of 128 lanes
      (lane-dense output store); no contraction-dim padding anywhere
    * weights cast to bf16 for the MXU, biases kept f32 (f32 bias-add/ReLU/tanh)
    """
    n = len(params)
    prepped = []
    for idx, (w, b) in enumerate(params):
        if idx == n - 1:
            fo = w.shape[1]
            fo_p = _round_up(fo, LANE)
            w = jnp.pad(w, ((0, 0), (0, fo_p - fo)))
            b = jnp.pad(b, ((0, 0), (0, fo_p - b.shape[1])))
        prepped.append((w.astype(jnp.bfloat16), b.astype(jnp.float32)))
    return prepped


def _batch_tiling(B, tile_b_max=512):
    """Pick a sublane-aligned batch tile such that:
       * the grid has >= 2 steps whenever the batch allows it (v7x: both TCs work)
       * the tile is capped at tile_b_max rows (keeps v5e's scoped VMEM happy)
       * total padded rows are always < one tile (never a wasted whole tile)
    """
    b8 = _round_up(max(B, 1), SUBLANE)
    if b8 <= SUBLANE:
        tile = SUBLANE
    else:
        tile = min(tile_b_max, _round_up(_cdiv(b8, 2), SUBLANE))
    n_tiles = _cdiv(b8, tile)
    return tile, n_tiles * tile


def actor_forward(state, prepped_params, *, out_dim, tile_b_max=512):
    """state: (B, embedding_dim * srm_size) f32 -> (B, out_dim) f32."""
    (w1, b1), (w2, b2), (w3, b3), (w4, b4) = prepped_params
    B, in_dim = state.shape
    assert w1.shape[0] == in_dim, "state feature dim must match first weight"
    out_p = w4.shape[1]

    tile_b, b_pad = _batch_tiling(B, tile_b_max)
    grid = (b_pad // tile_b,)

    x = state
    if b_pad != B:
        x = jnp.pad(state, ((0, b_pad - B), (0, 0)))   # batch pad only; no feature pad

    flat_params = (w1, b1, w2, b2, w3, b3, w4, b4)

    def batch_map(i):
        return (i, 0)

    def const_map(i):
        return (0, 0)   # weights/biases stay VMEM-resident across batch tiles

    def build_specs(weight_mode):
        specs = [pl.BlockSpec((tile_b, in_dim), batch_map)]
        for p in flat_params:
            if weight_mode is None:
                specs.append(pl.BlockSpec(p.shape, const_map))
            else:
                specs.append(pl.BlockSpec(p.shape, const_map, pipeline_mode=weight_mode))
        return specs

    # Explicit VMEM budget: double-buffered activation tiles + (worst case double-
    # buffered) resident weights, with generous headroom; stays << v7x's 64 MiB.
    act_bytes = 2 * tile_b * (in_dim + out_p) * 4
    param_bytes = 2 * sum(int(p.size) * p.dtype.itemsize for p in flat_params)
    vmem_limit = int(min(max(2 * (act_bytes + param_bytes), 16 << 20), 48 << 20))

    def run(weight_mode):
        return pl.pallas_call(
            actor_kernel,
            out_shape=jax.ShapeDtypeStruct((b_pad, out_p), jnp.float32),
            grid_spec=pltpu.PrefetchScalarGridSpec(
                num_scalar_prefetch=0,
                grid=grid,
                in_specs=build_specs(weight_mode),
                out_specs=pl.BlockSpec((tile_b, out_p), batch_map),
            ),
            compiler_params=pltpu.CompilerParams(
                dimension_semantics=("parallel",),   # shard batch tiles across TCs on v7x
                vmem_limit_bytes=vmem_limit,
            ),
        )(x, *flat_params)

    try:
        # Weights never change across grid steps -> single pipeline buffer is enough.
        out_padded = run(pl.Buffered(1))
    except Exception:
        # pipeline_mode not supported by this jax build: default double-buffered specs.
        out_padded = run(None)

    return out_padded[:B, :out_dim]


# ----------------------------------------------------------------------------- init
def kaiming_uniform(key, fan_in, fan_out):
    # Matches nn.init.kaiming_uniform_(layer.weight) (a=0, fan_in mode, leaky_relu
    # gain sqrt(2)).  Stored as (in, out) so the kernel computes x @ W directly.
    gain = math.sqrt(2.0)
    bound = gain * math.sqrt(3.0 / fan_in)
    return jax.random.uniform(key, (fan_in, fan_out), jnp.float32, -bound, bound)


def linear_bias(key, fan_in, fan_out):
    # Bias keeps nn.Linear's default init: U(-1/sqrt(fan_in), 1/sqrt(fan_in)).
    bound = 1.0 / math.sqrt(fan_in)
    return jax.random.uniform(key, (1, fan_out), jnp.float32, -bound, bound)


def init_params(key, embedding_dim, srm_size, hidden_dim):
    in_dim = embedding_dim * srm_size
    dims = [(in_dim, hidden_dim),
            (hidden_dim, hidden_dim),
            (hidden_dim, hidden_dim),
            (hidden_dim, embedding_dim)]
    params = []
    for (fi, fo) in dims:
        key, kw, kb = jax.random.split(key, 3)
        params.append((kaiming_uniform(kw, fi, fo), linear_bias(kb, fi, fo)))
    return params


# ----------------------------------------------------------------------------- main
if __name__ == "__main__":
    embedding_dim = 8
    srm_size = 4
    hidden_dim = 32
    batch = 2

    key = jax.random.PRNGKey(0)
    key, kx = jax.random.split(key)
    state = jax.random.normal(kx, (batch, embedding_dim * srm_size), jnp.float32)

    params = init_params(key, embedding_dim, srm_size, hidden_dim)
    prepped_params = prepare_params(params)   # one-time bf16 cast + final-layer lane pad

    out = actor_forward(state, prepped_params, out_dim=embedding_dim)
    jax.block_until_ready(out)

    # Pure-JAX f32 reference on the unpadded params.
    def ref(x, ps):
        (w1, b1), (w2, b2), (w3, b3), (w4, b4) = ps
        h = jnp.maximum(x @ w1 + b1, 0.0)
        h = jnp.maximum(h @ w2 + b2, 0.0)
        h = jnp.maximum(h @ w3 + b3, 0.0)
        return jnp.tanh(h @ w4 + b4)

    expected = ref(state, params)
    assert out.shape == (batch, embedding_dim)
    # bf16 matmul operands (f32 accumulation) -> ~1e-2-level deviation vs f32 reference.
    max_err = float(jnp.max(jnp.abs(out - expected)))
    assert jnp.allclose(out, expected, atol=5e-2, rtol=0.0), max_err

    print("KERNEL_OK")
</pallas_src>

<mosaic_0001>
module attributes {stable_mosaic.version = 11 : i64} {
  func.func @actor_kernel(%arg0: i32, %arg1: memref<8x32xf32, #tpu.memory_space<vmem>>, %arg2: memref<32x32xbf16, #tpu.memory_space<vmem>>, %arg3: memref<1x32xf32, #tpu.memory_space<vmem>>, %arg4: memref<32x32xbf16, #tpu.memory_space<vmem>>, %arg5: memref<1x32xf32, #tpu.memory_space<vmem>>, %arg6: memref<32x32xbf16, #tpu.memory_space<vmem>>, %arg7: memref<1x32xf32, #tpu.memory_space<vmem>>, %arg8: memref<32x128xbf16, #tpu.memory_space<vmem>>, %arg9: memref<1x128xf32, #tpu.memory_space<vmem>>, %arg10: memref<8x128xf32, #tpu.memory_space<vmem>>) attributes {dimension_semantics = [#tpu.dimension_semantics<parallel>], iteration_bounds = array<i64: 1>, scalar_prefetch = 0 : i64, scratch_operands = 0 : i64, tpu.core_type = #tpu.core_type<tc>, window_params = [{transform_indices = @transform_0, window_bounds = array<i64: 8, 32>}, {pipeline_mode = #tpu.pipeline_mode<synchronous>, transform_indices = @transform_1, window_bounds = array<i64: 32, 32>}, {pipeline_mode = #tpu.pipeline_mode<synchronous>, transform_indices = @transform_2, window_bounds = array<i64: 1, 32>}, {pipeline_mode = #tpu.pipeline_mode<synchronous>, transform_indices = @transform_3, window_bounds = array<i64: 32, 32>}, {pipeline_mode = #tpu.pipeline_mode<synchronous>, transform_indices = @transform_4, window_bounds = array<i64: 1, 32>}, {pipeline_mode = #tpu.pipeline_mode<synchronous>, transform_indices = @transform_5, window_bounds = array<i64: 32, 32>}, {pipeline_mode = #tpu.pipeline_mode<synchronous>, transform_indices = @transform_6, window_bounds = array<i64: 1, 32>}, {pipeline_mode = #tpu.pipeline_mode<synchronous>, transform_indices = @transform_7, window_bounds = array<i64: 32, 128>}, {pipeline_mode = #tpu.pipeline_mode<synchronous>, transform_indices = @transform_8, window_bounds = array<i64: 1, 128>}, {transform_indices = @transform_9, window_bounds = array<i64: 8, 128>}]} {
    %c0 = arith.constant 0 : index
    %c0_0 = arith.constant 0 : index
    %0 = vector.load %arg1[%c0, %c0_0] : memref<8x32xf32, #tpu.memory_space<vmem>>, vector<8x32xf32>
    %1 = arith.truncf %0 : vector<8x32xf32> to vector<8x32xbf16>
    %c0_1 = arith.constant 0 : index
    %c0_2 = arith.constant 0 : index
    %2 = vector.load %arg2[%c0_1, %c0_2] : memref<32x32xbf16, #tpu.memory_space<vmem>>, vector<32x32xbf16>
    %cst = arith.constant dense<0.000000e+00> : vector<8x32xf32>
    %3 = tpu.matmul %1, %2, %cst {dimension_numbers = #tpu.dot_dimension_numbers<[1], [0], [0], [1], [0, 0, 1, 1], [], []>} : vector<8x32xbf16>, vector<32x32xbf16>, vector<8x32xf32> -> vector<8x32xf32>
    %c0_3 = arith.constant 0 : index
    %c0_4 = arith.constant 0 : index
    %4 = vector.load %arg3[%c0_3, %c0_4] : memref<1x32xf32, #tpu.memory_space<vmem>>, vector<1x32xf32>
    %5 = vector.broadcast %4 : vector<1x32xf32> to vector<8x32xf32>
    %6 = arith.addf %3, %5 : vector<8x32xf32>
    %cst_5 = arith.constant 0.000000e+00 : f32
    %7 = vector.broadcast %cst_5 : f32 to vector<8x32xf32>
    %8 = arith.maximumf %6, %7 : vector<8x32xf32>
    %9 = arith.truncf %8 : vector<8x32xf32> to vector<8x32xbf16>
    %c0_6 = arith.constant 0 : index
    %c0_7 = arith.constant 0 : index
    %10 = vector.load %arg4[%c0_6, %c0_7] : memref<32x32xbf16, #tpu.memory_space<vmem>>, vector<32x32xbf16>
    %cst_8 = arith.constant dense<0.000000e+00> : vector<8x32xf32>
    %11 = tpu.matmul %9, %10, %cst_8 {dimension_numbers = #tpu.dot_dimension_numbers<[1], [0], [0], [1], [0, 0, 1, 1], [], []>} : vector<8x32xbf16>, vector<32x32xbf16>, vector<8x32xf32> -> vector<8x32xf32>
    %c0_9 = arith.constant 0 : index
    %c0_10 = arith.constant 0 : index
    %12 = vector.load %arg5[%c0_9, %c0_10] : memref<1x32xf32, #tpu.memory_space<vmem>>, vector<1x32xf32>
    %13 = vector.broadcast %12 : vector<1x32xf32> to vector<8x32xf32>
    %14 = arith.addf %11, %13 : vector<8x32xf32>
    %cst_11 = arith.constant 0.000000e+00 : f32
    %15 = vector.broadcast %cst_11 : f32 to vector<8x32xf32>
    %16 = arith.maximumf %14, %15 : vector<8x32xf32>
    %17 = arith.truncf %16 : vector<8x32xf32> to vector<8x32xbf16>
    %c0_12 = arith.constant 0 : index
    %c0_13 = arith.constant 0 : index
    %18 = vector.load %arg6[%c0_12, %c0_13] : memref<32x32xbf16, #tpu.memory_space<vmem>>, vector<32x32xbf16>
    %cst_14 = arith.constant dense<0.000000e+00> : vector<8x32xf32>
    %19 = tpu.matmul %17, %18, %cst_14 {dimension_numbers = #tpu.dot_dimension_numbers<[1], [0], [0], [1], [0, 0, 1, 1], [], []>} : vector<8x32xbf16>, vector<32x32xbf16>, vector<8x32xf32> -> vector<8x32xf32>
    %c0_15 = arith.constant 0 : index
    %c0_16 = arith.constant 0 : index
    %20 = vector.load %arg7[%c0_15, %c0_16] : memref<1x32xf32, #tpu.memory_space<vmem>>, vector<1x32xf32>
    %21 = vector.broadcast %20 : vector<1x32xf32> to vector<8x32xf32>
    %22 = arith.addf %19, %21 : vector<8x32xf32>
    %cst_17 = arith.constant 0.000000e+00 : f32
    %23 = vector.broadcast %cst_17 : f32 to vector<8x32xf32>
    %24 = arith.maximumf %22, %23 : vector<8x32xf32>
    %25 = arith.truncf %24 : vector<8x32xf32> to vector<8x32xbf16>
    %c0_18 = arith.constant 0 : index
    %c0_19 = arith.constant 0 : index
    %26 = vector.load %arg8[%c0_18, %c0_19] : memref<32x128xbf16, #tpu.memory_space<vmem>>, vector<32x128xbf16>
    %cst_20 = arith.constant dense<0.000000e+00> : vector<8x128xf32>
    %27 = tpu.matmul %25, %26, %cst_20 {dimension_numbers = #tpu.dot_dimension_numbers<[1], [0], [0], [1], [0, 0, 1, 1], [], []>} : vector<8x32xbf16>, vector<32x128xbf16>, vector<8x128xf32> -> vector<8x128xf32>
    %c0_21 = arith.constant 0 : index
    %c0_22 = arith.constant 0 : index
    %28 = vector.load %arg9[%c0_21, %c0_22] : memref<1x128xf32, #tpu.memory_space<vmem>>, vector<1x128xf32>
    %29 = vector.broadcast %28 : vector<1x128xf32> to vector<8x128xf32>
    %30 = arith.addf %27, %29 : vector<8x128xf32>
    %31 = math.tanh %30 : vector<8x128xf32>
    %c0_23 = arith.constant 0 : index
    %c0_24 = arith.constant 0 : index
    %32 = vector.load %arg10[%c0_23, %c0_24] : memref<8x128xf32, #tpu.memory_space<vmem>>, vector<8x128xf32>
    tpu.vector_store %arg10[%c0_23, %c0_24], %31 {strides = array<i32>} : memref<8x128xf32, #tpu.memory_space<vmem>>, vector<8x128xf32>,
    return
  }
  func.func @transform_0(%arg0: i32) -> (i32, i32) {
    %c0_i32 = arith.constant 0 : i32
    %c0_i32_0 = arith.constant 0 : i32
    return %arg0, %c0_i32 : i32, i32
  }
  func.func @transform_1(%arg0: i32) -> (i32, i32) {
    %c0_i32 = arith.constant 0 : i32
    %c0_i32_0 = arith.constant 0 : i32
    %c0_i32_1 = arith.constant 0 : i32
    return %c0_i32, %c0_i32_0 : i32, i32
  }
  func.func @transform_2(%arg0: i32) -> (i32, i32) {
    %c0_i32 = arith.constant 0 : i32
    %c0_i32_0 = arith.constant 0 : i32
    %c0_i32_1 = arith.constant 0 : i32
    return %c0_i32, %c0_i32_0 : i32, i32
  }
  func.func @transform_3(%arg0: i32) -> (i32, i32) {
    %c0_i32 = arith.constant 0 : i32
    %c0_i32_0 = arith.constant 0 : i32
    %c0_i32_1 = arith.constant 0 : i32
    return %c0_i32, %c0_i32_0 : i32, i32
  }
  func.func @transform_4(%arg0: i32) -> (i32, i32) {
    %c0_i32 = arith.constant 0 : i32
    %c0_i32_0 = arith.constant 0 : i32
    %c0_i32_1 = arith.constant 0 : i32
    return %c0_i32, %c0_i32_0 : i32, i32
  }
  func.func @transform_5(%arg0: i32) -> (i32, i32) {
    %c0_i32 = arith.constant 0 : i32
    %c0_i32_0 = arith.constant 0 : i32
    %c0_i32_1 = arith.constant 0 : i32
    return %c0_i32, %c0_i32_0 : i32, i32
  }
  func.func @transform_6(%arg0: i32) -> (i32, i32) {
    %c0_i32 = arith.constant 0 : i32
    %c0_i32_0 = arith.constant 0 : i32
    %c0_i32_1 = arith.constant 0 : i32
    return %c0_i32, %c0_i32_0 : i32, i32
  }
  func.func @transform_7(%arg0: i32) -> (i32, i32) {
    %c0_i32 = arith.constant 0 : i32
    %c0_i32_0 = arith.constant 0 : i32
    %c0_i32_1 = arith.constant 0 : i32
    return %c0_i32, %c0_i32_0 : i32, i32
  }
  func.func @transform_8(%arg0: i32) -> (i32, i32) {
    %c0_i32 = arith.constant 0 : i32
    %c0_i32_0 = arith.constant 0 : i32
    %c0_i32_1 = arith.constant 0 : i32
    return %c0_i32, %c0_i32_0 : i32, i32
  }
  func.func @transform_9(%arg0: i32) -> (i32, i32) {
    %c0_i32 = arith.constant 0 : i32
    %c0_i32_0 = arith.constant 0 : i32
    return %arg0, %c0_i32 : i32, i32
  }
}

module attributes {stable_mosaic.version = 11 : i64} {
  func.func @actor_kernel(%arg0: i32, %arg1: memref<8x32xf32, #tpu.memory_space<vmem>>, %arg2: memref<32x32xbf16, #tpu.memory_space<vmem>>, %arg3: memref<1x32xf32, #tpu.memory_space<vmem>>, %arg4: memref<32x32xbf16, #tpu.memory_space<vmem>>, %arg5: memref<1x32xf32, #tpu.memory_space<vmem>>, %arg6: memref<32x32xbf16, #tpu.memory_space<vmem>>, %arg7: memref<1x32xf32, #tpu.memory_space<vmem>>, %arg8: memref<32x128xbf16, #tpu.memory_space<vmem>>, %arg9: memref<1x128xf32, #tpu.memory_space<vmem>>, %arg10: memref<8x128xf32, #tpu.memory_space<vmem>>) attributes {dimension_semantics = [#tpu.dimension_semantics<parallel>], iteration_bounds = array<i64: 1>, scalar_prefetch = 0 : i64, scratch_operands = 0 : i64, tpu.core_type = #tpu.core_type<tc>, window_params = [{transform_indices = @transform_0, window_bounds = array<i64: 8, 32>}, {pipeline_mode = #tpu.pipeline_mode<synchronous>, transform_indices = @transform_1, window_bounds = array<i64: 32, 32>}, {pipeline_mode = #tpu.pipeline_mode<synchronous>, transform_indices = @transform_2, window_bounds = array<i64: 1, 32>}, {pipeline_mode = #tpu.pipeline_mode<synchronous>, transform_indices = @transform_3, window_bounds = array<i64: 32, 32>}, {pipeline_mode = #tpu.pipeline_mode<synchronous>, transform_indices = @transform_4, window_bounds = array<i64: 1, 32>}, {pipeline_mode = #tpu.pipeline_mode<synchronous>, transform_indices = @transform_5, window_bounds = array<i64: 32, 32>}, {pipeline_mode = #tpu.pipeline_mode<synchronous>, transform_indices = @transform_6, window_bounds = array<i64: 1, 32>}, {pipeline_mode = #tpu.pipeline_mode<synchronous>, transform_indices = @transform_7, window_bounds = array<i64: 32, 128>}, {pipeline_mode = #tpu.pipeline_mode<synchronous>, transform_indices = @transform_8, window_bounds = array<i64: 1, 128>}, {transform_indices = @transform_9, window_bounds = array<i64: 8, 128>}]} {
    %c0 = arith.constant 0 : index
    %c0_0 = arith.constant 0 : index
    %0 = vector.load %arg1[%c0, %c0_0] : memref<8x32xf32, #tpu.memory_space<vmem>>, vector<8x32xf32>
    %1 = arith.truncf %0 : vector<8x32xf32> to vector<8x32xbf16>
    %c0_1 = arith.constant 0 : index
    %c0_2 = arith.constant 0 : index
    %2 = vector.load %arg2[%c0_1, %c0_2] : memref<32x32xbf16, #tpu.memory_space<vmem>>, vector<32x32xbf16>
    %cst = arith.constant dense<0.000000e+00> : vector<8x32xf32>
    %3 = tpu.matmul %1, %2, %cst {dimension_numbers = #tpu.dot_dimension_numbers<[1], [0], [0], [1], [0, 0, 1, 1], [], []>} : vector<8x32xbf16>, vector<32x32xbf16>, vector<8x32xf32> -> vector<8x32xf32>
    %c0_3 = arith.constant 0 : index
    %c0_4 = arith.constant 0 : index
    %4 = vector.load %arg3[%c0_3, %c0_4] : memref<1x32xf32, #tpu.memory_space<vmem>>, vector<1x32xf32>
    %5 = vector.broadcast %4 : vector<1x32xf32> to vector<8x32xf32>
    %6 = arith.addf %3, %5 : vector<8x32xf32>
    %cst_5 = arith.constant 0.000000e+00 : f32
    %7 = vector.broadcast %cst_5 : f32 to vector<8x32xf32>
    %8 = arith.maximumf %6, %7 : vector<8x32xf32>
    %9 = arith.truncf %8 : vector<8x32xf32> to vector<8x32xbf16>
    %c0_6 = arith.constant 0 : index
    %c0_7 = arith.constant 0 : index
    %10 = vector.load %arg4[%c0_6, %c0_7] : memref<32x32xbf16, #tpu.memory_space<vmem>>, vector<32x32xbf16>
    %cst_8 = arith.constant dense<0.000000e+00> : vector<8x32xf32>
    %11 = tpu.matmul %9, %10, %cst_8 {dimension_numbers = #tpu.dot_dimension_numbers<[1], [0], [0], [1], [0, 0, 1, 1], [], []>} : vector<8x32xbf16>, vector<32x32xbf16>, vector<8x32xf32> -> vector<8x32xf32>
    %c0_9 = arith.constant 0 : index
    %c0_10 = arith.constant 0 : index
    %12 = vector.load %arg5[%c0_9, %c0_10] : memref<1x32xf32, #tpu.memory_space<vmem>>, vector<1x32xf32>
    %13 = vector.broadcast %12 : vector<1x32xf32> to vector<8x32xf32>
    %14 = arith.addf %11, %13 : vector<8x32xf32>
    %cst_11 = arith.constant 0.000000e+00 : f32
    %15 = vector.broadcast %cst_11 : f32 to vector<8x32xf32>
    %16 = arith.maximumf %14, %15 : vector<8x32xf32>
    %17 = arith.truncf %16 : vector<8x32xf32> to vector<8x32xbf16>
    %c0_12 = arith.constant 0 : index
    %c0_13 = arith.constant 0 : index
    %18 = vector.load %arg6[%c0_12, %c0_13] : memref<32x32xbf16, #tpu.memory_space<vmem>>, vector<32x32xbf16>
    %cst_14 = arith.constant dense<0.000000e+00> : vector<8x32xf32>
    %19 = tpu.matmul %17, %18, %cst_14 {dimension_numbers = #tpu.dot_dimension_numbers<[1], [0], [0], [1], [0, 0, 1, 1], [], []>} : vector<8x32xbf16>, vector<32x32xbf16>, vector<8x32xf32> -> vector<8x32xf32>
    %c0_15 = arith.constant 0 : index
    %c0_16 = arith.constant 0 : index
    %20 = vector.load %arg7[%c0_15, %c0_16] : memref<1x32xf32, #tpu.memory_space<vmem>>, vector<1x32xf32>
    %21 = vector.broadcast %20 : vector<1x32xf32> to vector<8x32xf32>
    %22 = arith.addf %19, %21 : vector<8x32xf32>
    %cst_17 = arith.constant 0.000000e+00 : f32
    %23 = vector.broadcast %cst_17 : f32 to vector<8x32xf32>
    %24 = arith.maximumf %22, %23 : vector<8x32xf32>
    %25 = arith.truncf %24 : vector<8x32xf32> to vector<8x32xbf16>
    %c0_18 = arith.constant 0 : index
    %c0_19 = arith.constant 0 : index
    %26 = vector.load %arg8[%c0_18, %c0_19] : memref<32x128xbf16, #tpu.memory_space<vmem>>, vector<32x128xbf16>
    %cst_20 = arith.constant dense<0.000000e+00> : vector<8x128xf32>
    %27 = tpu.matmul %25, %26, %cst_20 {dimension_numbers = #tpu.dot_dimension_numbers<[1], [0], [0], [1], [0, 0, 1, 1], [], []>} : vector<8x32xbf16>, vector<32x128xbf16>, vector<8x128xf32> -> vector<8x128xf32>
    %c0_21 = arith.constant 0 : index
    %c0_22 = arith.constant 0 : index
    %28 = vector.load %arg9[%c0_21, %c0_22] : memref<1x128xf32, #tpu.memory_space<vmem>>, vector<1x128xf32>
    %29 = vector.broadcast %28 : vector<1x128xf32> to vector<8x128xf32>
    %30 = arith.addf %27, %29 : vector<8x128xf32>
    %31 = math.tanh %30 : vector<8x128xf32>
    %c0_23 = arith.constant 0 : index
    %c0_24 = arith.constant 0 : index
    %32 = vector.load %arg10[%c0_23, %c0_24] : memref<8x128xf32, #tpu.memory_space<vmem>>, vector<8x128xf32>
    tpu.vector_store %arg10[%c0_23, %c0_24], %31 {strides = array<i32>} : memref<8x128xf32, #tpu.memory_space<vmem>>, vector<8x128xf32>,
    return
  }
  func.func @transform_0(%arg0: i32) -> (i32, i32) {
    %c0_i32 = arith.constant 0 : i32
    %c0_i32_0 = arith.constant 0 : i32
    return %arg0, %c0_i32 : i32, i32
  }
  func.func @transform_1(%arg0: i32) -> (i32, i32) {
    %c0_i32 = arith.constant 0 : i32
    %c0_i32_0 = arith.constant 0 : i32
    %c0_i32_1 = arith.constant 0 : i32
    return %c0_i32, %c0_i32_0 : i32, i32
  }
  func.func @transform_2(%arg0: i32) -> (i32, i32) {
    %c0_i32 = arith.constant 0 : i32
    %c0_i32_0 = arith.constant 0 : i32
    %c0_i32_1 = arith.constant 0 : i32
    return %c0_i32, %c0_i32_0 : i32, i32
  }
  func.func @transform_3(%arg0: i32) -> (i32, i32) {
    %c0_i32 = arith.constant 0 : i32
    %c0_i32_0 = arith.constant 0 : i32
    %c0_i32_1 = arith.constant 0 : i32
    return %c0_i32, %c0_i32_0 : i32, i32
  }
  func.func @transform_4(%arg0: i32) -> (i32, i32) {
    %c0_i32 = arith.constant 0 : i32
    %c0_i32_0 = arith.constant 0 : i32
    %c0_i32_1 = arith.constant 0 : i32
    return %c0_i32, %c0_i32_0 : i32, i32
  }
  func.func @transform_5(%arg0: i32) -> (i32, i32) {
    %c0_i32 = arith.constant 0 : i32
    %c0_i32_0 = arith.constant 0 : i32
    %c0_i32_1 = arith.constant 0 : i32
    return %c0_i32, %c0_i32_0 : i32, i32
  }
  func.func @transform_6(%arg0: i32) -> (i32, i32) {
    %c0_i32 = arith.constant 0 : i32
    %c0_i32_0 = arith.constant 0 : i32
    %c0_i32_1 = arith.constant 0 : i32
    return %c0_i32, %c0_i32_0 : i32, i32
  }
  func.func @transform_7(%arg0: i32) -> (i32, i32) {
    %c0_i32 = arith.constant 0 : i32
    %c0_i32_0 = arith.constant 0 : i32
    %c0_i32_1 = arith.constant 0 : i32
    return %c0_i32, %c0_i32_0 : i32, i32
  }
  func.func @transform_8(%arg0: i32) -> (i32, i32) {
    %c0_i32 = arith.constant 0 : i32
    %c0_i32_0 = arith.constant 0 : i32
    %c0_i32_1 = arith.constant 0 : i32
    return %c0_i32, %c0_i32_0 : i32, i32
  }
  func.func @transform_9(%arg0: i32) -> (i32, i32) {
    %c0_i32 = arith.constant 0 : i32
    %c0_i32_0 = arith.constant 0 : i32
    return %arg0, %c0_i32 : i32, i32
  }
}

</mosaic_0001>

<bundles_post_ra>
// kernel: tpu_custom_call.1
= control target key start
LH: loop header
LB: loop body
LE: loop exit
PB: predicated region body
PF: predicated region fallthrough
CT: control target
= control target key end

     0   :  { %14 = vsyncpa [#allocation3], 0  ;;  %s586_s0 = inlined_call_operand.hbm [shape: f32[8,32], index: 0, kind: input, shape index: {}]   ;;  %s587_s1 = inlined_call_operand.hbm [shape: bf16[32,32], index: 1, kind: input, shape index: {}]   ;;  %s588_s2 = inlined_call_operand.vmem [shape: f32[1,32], index: 2, kind: input, shape index: {}]   ;;  %s589_s3 = inlined_call_operand.hbm [shape: bf16[32,32], index: 3, kind: input, shape index: {}]   ;;  %s590_s4 = inlined_call_operand.vmem [shape: f32[1,32], index: 4, kind: input, shape index: {}]   ;;  %s591_s5 = inlined_call_operand.hbm [shape: bf16[32,32], index: 5, kind: input, shape index: {}]   ;;  %s592_s6 = inlined_call_operand.vmem [shape: f32[1,32], index: 6, kind: input, shape index: {}]   ;;  %s593_s7 = inlined_call_operand.hbm [shape: bf16[32,128], index: 7, kind: input, shape index: {}]   ;;  %s594_s8 = inlined_call_operand.vmem [shape: f32[1,128], index: 8, kind: input, shape index: {}]   ;;  %s595_s9 = inlined_call_operand.hbm [shape: f32[8,128], index: 9, kind: output, shape index: {}]  }
   0x1   :  { %15 = vsyncpa [#allocation6], 0 }
   0x2   :  { %16 = vsyncpa [#allocation9], 0  ;;  %s33_s11 = sshll.u32 %s587_s1, 4  ;;  %s34_s11 = int_to_ptr.hbm [resolvable:$true] %s33_s11 }
   0x3   :  { %17 = vsyncpa [#allocation4], 0  ;;  %s494_s12 = smov [#allocation5]   ;;  %s63_s16 = sshll.u32 %s591_s5, 4  ;;  %s64_s16 = int_to_ptr.hbm [resolvable:$true] %s63_s16 }
   0x4   :  { %s35_s13 = sshll.u32 %s494_s12, 4  ;;  %s495_s17 = smov 64   ;;  %s36_s13 = int_to_ptr.vmem [resolvable:$true] %s35_s13 }
   0x5   :  { %s496_s18 = smov 4   ;;  %s497_s19 = smov [#allocation8]  }
   0x6   :  { %41 = dma.hbm_to_vmem [thread:$0]  %s34_s11, 256, %s36_s13, [#allocation6], %s495_s17, %s495_s17, %s496_s18  }
   0x7   :  { %s65_s20 = sshll.u32 %s497_s19, 4  ;;  %s23_s23 = sshll.u32 %s586_s0, 4  ;;  %s66_s20 = int_to_ptr.vmem [resolvable:$true] %s65_s20  ;;  %s24_s23 = int_to_ptr.hbm [resolvable:$true] %s23_s23 }
   0x8   :  { %71 = dma.hbm_to_vmem [thread:$0]  %s64_s16, 256, %s66_s20, [#allocation9], %s495_s17, %s495_s17, %s496_s18  }
   0x9   :  { %s48_s25 = sshll.u32 %s589_s3, 4  ;;  %s498_s26 = smov [#allocation2]   ;;  %s49_s25 = int_to_ptr.hbm [resolvable:$true] %s48_s25 }
   0xa   :  { %s25_s27 = sshll.u32 %s498_s26, 4  ;;  %s499_s5 = smov [#allocation7]   ;;  %s26_s27 = int_to_ptr.vmem [resolvable:$true] %s25_s27 }
   0xb   :  { %28 = dma.hbm_to_vmem [thread:$0]  %s24_s23, 128, %s26_s27, [#allocation3]  }
   0xc   :  { %s50_s28 = sshll.u32 %s499_s5, 4  ;;  %s78_s10 = sshll.u32 %s593_s7, 4  ;;  %s51_s28 = int_to_ptr.vmem [resolvable:$true] %s50_s28  ;;  %s79_s10 = int_to_ptr.hbm [resolvable:$true] %s78_s10 }
   0xd   :  { %56 = dma.hbm_to_vmem [thread:$0]  %s49_s25, 256, %s51_s28, [#allocation6], %s495_s17, %s495_s17, %s496_s18  }
   0xe   :  { %s500_s0 = smov [#allocation10]  }
   0xf   :  { %s80_s11 = sshll.u32 %s500_s0, 4  ;;  %s81_s11 = int_to_ptr.vmem [resolvable:$true] %s80_s11 }
  0x10   :  { %86 = dma.hbm_to_vmem [thread:$0]  %s79_s10, 256, %s81_s11, [#allocation9], %s495_s17, %s495_s17, %s496_s18  }
  0x11   :  { %486 = dma.done.wait [#allocation3], 128  }
  0x12   :  { %487 = vsyncadd [#allocation3], 4294967168 }
  0x13   :  { %488 = dma.done.wait [#allocation6], 512  }
  0x14   :  { %489 = vsyncadd [#allocation6], 4294966784 }
  0x15   :  { %490 = dma.done.wait [#allocation9], 512  }
  0x16   :  { %491 = vsyncadd [#allocation9], 4294966784  ;;  %v321_v0 = vld [vmem:[#allocation5 + $0x8] sm:$0xff]  ;;  %v320_v1 = vld [vmem:[#allocation5] sm:$0xff]  ;;  %vm132_vm0 = vcmask 261120   ;;  %s501_s16 = smov [#allocation11]  }
  0x17   :  { %142 = vmatpush.bf16.msra.mxu0 %v321_v0  ;;  %v110_v2 = vld [vmem:[#allocation2] sm:$0xff]  ;;  %v322_v5 = vld [vmem:[#allocation7] sm:$0xff]  ;;  %v325_v12 = vld [vmem:[#allocation8 + $0x8] sm:$0xff]  ;;  %s270_s17 = sshll.u32 %s501_s16, 4  ;;  %s271_s17 = int_to_ptr.vmem [resolvable:$true] %s270_s17 }
  0x18   :  { %v111_v3 = vpack.c.bf16 %v110_v2, %v110_v2  ;;  %v323_v4 = vld [vmem:[#allocation7 + $0x8] sm:$0xff]  ;;  %218 = vmatpush.bf16.msra.mxu2 %v325_v12  ;;  %v324_v13 = vld [vmem:[#allocation8] sm:$0xff]  ;;  %v326_v21 = vld [vmem:[#allocation10] sm:$0xff] }
  0x19   :  { %180 = vmatpush.bf16.msra.mxu1 %v323_v4  ;;  %v336_v6 = vld [vmem:[%s588_s2] ss:$0 sm:$0xff] }
  0x1a   :  { %v337_v14 = vld [vmem:[%s590_s4] ss:$0 sm:$0xff] }
  0x1b   :  { %143 = vmatpush.bf16.msra.mxu0 %v320_v1  ;;  %v327_v20 = vld [vmem:[#allocation10 + $0x8] sm:$0xff] }
  0x1c   :  { %219 = vmatpush.bf16.msra.mxu2 %v324_v13  ;;  %256 = vmatpush.bf16.msra.mxu3 %v327_v20  ;;  %v338_v22 = vld [vmem:[%s592_s6] ss:$0 sm:$0xff]  ;;  %s272_s6 = sshll.u32 %s595_s9, 4  ;;  %s273_s6 = int_to_ptr.hbm [resolvable:$true] %s272_s6 }
  0x1d   :  { %181 = vmatpush.bf16.msra.mxu1 %v322_v5  ;;  %v339_v28 = vld [vmem:[%s594_s8] ss:$0 sm:$0xff] }
  0x1e   :  { %292 = vmatmul.msk.bf16.vlgmr.msra.gmra.mxu0 %vm132_vm0, %v111_v3 }
  0x20   :  { %257 = vmatpush.bf16.msra.mxu3 %v326_v21 }
  0x9b   :  { %v145_v7 = vpop.f32.mrf.mxu0 }
  0x9c   :  { %v146_v8 = vadd.f32 %v336_v6, %v145_v7 }
  0x9e   :  { %v149_v9 = vmax.f32 %v146_v8, 0.0 }
  0xa0   :  { %v150_v10 = vpack.c.bf16 %v149_v9, %v149_v9 }
  0xa2   :  { %301 = vmatmul.msk.bf16.vlgmr.msra.gmra.mxu1 %vm132_vm0, %v150_v10 }
  0xa3   :  { %v147_v11 = vpop.f32.mrf.mxu0 }
 0x11f   :  { %v183_v15 = vpop.f32.mrf.mxu1 }
 0x120   :  { %v184_v16 = vadd.f32 %v337_v14, %v183_v15 }
 0x122   :  { %v187_v17 = vmax.f32 %v184_v16, 0.0 }
 0x124   :  { %v188_v18 = vpack.c.bf16 %v187_v17, %v187_v17 }
 0x126   :  { %310 = vmatmul.msk.bf16.vlgmr.msra.gmra.mxu2 %vm132_vm0, %v188_v18 }
 0x127   :  { %v185_v19 = vpop.f32.mrf.mxu1 }
 0x1a9   :  { %v221_v23 = vpop.f32.mrf.mxu2 }
 0x1aa   :  { %v222_v24 = vadd.f32 %v338_v22, %v221_v23 }
 0x1ac   :  { %v225_v25 = vmax.f32 %v222_v24, 0.0 }
 0x1ae   :  { %v226_v26 = vpack.c.bf16 %v225_v25, %v225_v25 }
 0x1b0   :  { %319 = vmatmul.msk.bf16.vlgmr.msra.gmra.mxu3 %vm132_vm0, %v226_v26 }
 0x1b1   :  { %v223_v27 = vpop.f32.mrf.mxu2 }
 0x233   :  { %v259_v29 = vpop.f32.mrf.mxu3 }
 0x234   :  { %v260_v30 = vadd.f32 %v339_v28, %v259_v29 }
 0x236   :  { %340 = vtanh.f32 %v260_v30 }
 0x23b   :  { %v261_v31 = vpop.f32.mrf.mxu3 }
 0x23c   :  { %v341_v32 = vpop.eup %340 }
 0x23d   :  { %264 = vst [vmem:[#allocation11] sm:$0xff] %v341_v32 }
 0x23e   :  { %275 = dma.vmem_to_hbm [thread:$0]  %s271_s17, 128, %s273_s6, [#allocation4]  }
 0x23f   :  { %492 = dma.done.wait [#allocation4], 128  }
 0x240   :  { %493 = vsyncadd [#allocation4], 4294967168 }
 0x241   :  { %280 = vsyncpa [#allocation3], 1 }
 0x242   :  { %281 = vsyncpa [#allocation6], 1 }
 0x243   :  { %282 = vsyncpa [#allocation9], 1 }
 0x244   :  { %283 = vsyncpa [#allocation4], 1 }

// kernel: tpu_custom_call.1
= control target key start
LH: loop header
LB: loop body
LE: loop exit
PB: predicated region body
PF: predicated region fallthrough
CT: control target
= control target key end

     0   :  { %14 = vsyncpa [#allocation3], 0  ;;  %s586_s0 = inlined_call_operand.hbm [shape: f32[8,32], index: 0, kind: input, shape index: {}]   ;;  %s587_s1 = inlined_call_operand.hbm [shape: bf16[32,32], index: 1, kind: input, shape index: {}]   ;;  %s588_s2 = inlined_call_operand.vmem [shape: f32[1,32], index: 2, kind: input, shape index: {}]   ;;  %s589_s3 = inlined_call_operand.hbm [shape: bf16[32,32], index: 3, kind: input, shape index: {}]   ;;  %s590_s4 = inlined_call_operand.vmem [shape: f32[1,32], index: 4, kind: input, shape index: {}]   ;;  %s591_s5 = inlined_call_operand.hbm [shape: bf16[32,32], index: 5, kind: input, shape index: {}]   ;;  %s592_s6 = inlined_call_operand.vmem [shape: f32[1,32], index: 6, kind: input, shape index: {}]   ;;  %s593_s7 = inlined_call_operand.hbm [shape: bf16[32,128], index: 7, kind: input, shape index: {}]   ;;  %s594_s8 = inlined_call_operand.vmem [shape: f32[1,128], index: 8, kind: input, shape index: {}]   ;;  %s595_s9 = inlined_call_operand.hbm [shape: f32[8,128], index: 9, kind: output, shape index: {}]  }
   0x1   :  { %15 = vsyncpa [#allocation6], 0 }
   0x2   :  { %16 = vsyncpa [#allocation9], 0  ;;  %s33_s11 = sshll.u32 %s587_s1, 4  ;;  %s34_s11 = int_to_ptr.hbm [resolvable:$true] %s33_s11 }
   0x3   :  { %17 = vsyncpa [#allocation4], 0  ;;  %s494_s12 = smov [#allocation5]   ;;  %s63_s16 = sshll.u32 %s591_s5, 4  ;;  %s64_s16 = int_to_ptr.hbm [resolvable:$true] %s63_s16 }
   0x4   :  { %s35_s13 = sshll.u32 %s494_s12, 4  ;;  %s495_s17 = smov 64   ;;  %s36_s13 = int_to_ptr.vmem [resolvable:$true] %s35_s13 }
   0x5   :  { %s496_s18 = smov 4   ;;  %s497_s19 = smov [#allocation8]  }
   0x6   :  { %41 = dma.hbm_to_vmem [thread:$0]  %s34_s11, 256, %s36_s13, [#allocation6], %s495_s17, %s495_s17, %s496_s18  }
   0x7   :  { %s65_s20 = sshll.u32 %s497_s19, 4  ;;  %s23_s23 = sshll.u32 %s586_s0, 4  ;;  %s66_s20 = int_to_ptr.vmem [resolvable:$true] %s65_s20  ;;  %s24_s23 = int_to_ptr.hbm [resolvable:$true] %s23_s23 }
   0x8   :  { %71 = dma.hbm_to_vmem [thread:$0]  %s64_s16, 256, %s66_s20, [#allocation9], %s495_s17, %s495_s17, %s496_s18  }
   0x9   :  { %s48_s25 = sshll.u32 %s589_s3, 4  ;;  %s498_s26 = smov [#allocation2]   ;;  %s49_s25 = int_to_ptr.hbm [resolvable:$true] %s48_s25 }
   0xa   :  { %s25_s27 = sshll.u32 %s498_s26, 4  ;;  %s499_s5 = smov [#allocation7]   ;;  %s26_s27 = int_to_ptr.vmem [resolvable:$true] %s25_s27 }
   0xb   :  { %28 = dma.hbm_to_vmem [thread:$0]  %s24_s23, 128, %s26_s27, [#allocation3]  }
   0xc   :  { %s50_s28 = sshll.u32 %s499_s5, 4  ;;  %s78_s10 = sshll.u32 %s593_s7, 4  ;;  %s51_s28 = int_to_ptr.vmem [resolvable:$true] %s50_s28  ;;  %s79_s10 = int_to_ptr.hbm [resolvable:$true] %s78_s10 }
   0xd   :  { %56 = dma.hbm_to_vmem [thread:$0]  %s49_s25, 256, %s51_s28, [#allocation6], %s495_s17, %s495_s17, %s496_s18  }
   0xe   :  { %s500_s0 = smov [#allocation10]  }
   0xf   :  { %s80_s11 = sshll.u32 %s500_s0, 4  ;;  %s81_s11 = int_to_ptr.vmem [resolvable:$true] %s80_s11 }
  0x10   :  { %86 = dma.hbm_to_vmem [thread:$0]  %s79_s10, 256, %s81_s11, [#allocation9], %s495_s17, %s495_s17, %s496_s18  }
  0x11   :  { %486 = dma.done.wait [#allocation3], 128  }
  0x12   :  { %487 = vsyncadd [#allocation3], 4294967168 }
  0x13   :  { %488 = dma.done.wait [#allocation6], 512  }
  0x14   :  { %489 = vsyncadd [#allocation6], 4294966784 }
  0x15   :  { %490 = dma.done.wait [#allocation9], 512  }
  0x16   :  { %491 = vsyncadd [#allocation9], 4294966784  ;;  %v321_v0 = vld [vmem:[#allocation5 + $0x8] sm:$0xff]  ;;  %v320_v1 = vld [vmem:[#allocation5] sm:$0xff]  ;;  %vm132_vm0 = vcmask 261120   ;;  %s501_s16 = smov [#allocation11]  }
  0x17   :  { %142 = vmatpush.bf16.msra.mxu0 %v321_v0  ;;  %v110_v2 = vld [vmem:[#allocation2] sm:$0xff]  ;;  %v322_v5 = vld [vmem:[#allocation7] sm:$0xff]  ;;  %v325_v12 = vld [vmem:[#allocation8 + $0x8] sm:$0xff]  ;;  %s270_s17 = sshll.u32 %s501_s16, 4  ;;  %s271_s17 = int_to_ptr.vmem [resolvable:$true] %s270_s17 }
  0x18   :  { %v111_v3 = vpack.c.bf16 %v110_v2, %v110_v2  ;;  %v323_v4 = vld [vmem:[#allocation7 + $0x8] sm:$0xff]  ;;  %218 = vmatpush.bf16.msra.mxu2 %v325_v12  ;;  %v324_v13 = vld [vmem:[#allocation8] sm:$0xff]  ;;  %v326_v21 = vld [vmem:[#allocation10] sm:$0xff] }
  0x19   :  { %180 = vmatpush.bf16.msra.mxu1 %v323_v4  ;;  %v336_v6 = vld [vmem:[%s588_s2] ss:$0 sm:$0xff] }
  0x1a   :  { %v337_v14 = vld [vmem:[%s590_s4] ss:$0 sm:$0xff] }
  0x1b   :  { %143 = vmatpush.bf16.msra.mxu0 %v320_v1  ;;  %v327_v20 = vld [vmem:[#allocation10 + $0x8] sm:$0xff] }
  0x1c   :  { %219 = vmatpush.bf16.msra.mxu2 %v324_v13  ;;  %256 = vmatpush.bf16.msra.mxu3 %v327_v20  ;;  %v338_v22 = vld [vmem:[%s592_s6] ss:$0 sm:$0xff]  ;;  %s272_s6 = sshll.u32 %s595_s9, 4  ;;  %s273_s6 = int_to_ptr.hbm [resolvable:$true] %s272_s6 }
  0x1d   :  { %181 = vmatpush.bf16.msra.mxu1 %v322_v5  ;;  %v339_v28 = vld [vmem:[%s594_s8] ss:$0 sm:$0xff] }
  0x1e   :  { %292 = vmatmul.msk.bf16.vlgmr.msra.gmra.mxu0 %vm132_vm0, %v111_v3 }
  0x20   :  { %257 = vmatpush.bf16.msra.mxu3 %v326_v21 }
  0x9b   :  { %v145_v7 = vpop.f32.mrf.mxu0 }
  0x9c   :  { %v146_v8 = vadd.f32 %v336_v6, %v145_v7 }
  0x9e   :  { %v149_v9 = vmax.f32 %v146_v8, 0.0 }
  0xa0   :  { %v150_v10 = vpack.c.bf16 %v149_v9, %v149_v9 }
  0xa2   :  { %301 = vmatmul.msk.bf16.vlgmr.msra.gmra.mxu1 %vm132_vm0, %v150_v10 }
  0xa3   :  { %v147_v11 = vpop.f32.mrf.mxu0 }
 0x11f   :  { %v183_v15 = vpop.f32.mrf.mxu1 }
 0x120   :  { %v184_v16 = vadd.f32 %v337_v14, %v183_v15 }
 0x122   :  { %v187_v17 = vmax.f32 %v184_v16, 0.0 }
 0x124   :  { %v188_v18 = vpack.c.bf16 %v187_v17, %v187_v17 }
 0x126   :  { %310 = vmatmul.msk.bf16.vlgmr.msra.gmra.mxu2 %vm132_vm0, %v188_v18 }
 0x127   :  { %v185_v19 = vpop.f32.mrf.mxu1 }
 0x1a9   :  { %v221_v23 = vpop.f32.mrf.mxu2 }
 0x1aa   :  { %v222_v24 = vadd.f32 %v338_v22, %v221_v23 }
 0x1ac   :  { %v225_v25 = vmax.f32 %v222_v24, 0.0 }
 0x1ae   :  { %v226_v26 = vpack.c.bf16 %v225_v25, %v225_v25 }
 0x1b0   :  { %319 = vmatmul.msk.bf16.vlgmr.msra.gmra.mxu3 %vm132_vm0, %v226_v26 }
 0x1b1   :  { %v223_v27 = vpop.f32.mrf.mxu2 }
 0x233   :  { %v259_v29 = vpop.f32.mrf.mxu3 }
 0x234   :  { %v260_v30 = vadd.f32 %v339_v28, %v259_v29 }
 0x236   :  { %340 = vtanh.f32 %v260_v30 }
 0x23b   :  { %v261_v31 = vpop.f32.mrf.mxu3 }
 0x23c   :  { %v341_v32 = vpop.eup %340 }
 0x23d   :  { %264 = vst [vmem:[#allocation11] sm:$0xff] %v341_v32 }
 0x23e   :  { %275 = dma.vmem_to_hbm [thread:$0]  %s271_s17, 128, %s273_s6, [#allocation4]  }
 0x23f   :  { %492 = dma.done.wait [#allocation4], 128  }
 0x240   :  { %493 = vsyncadd [#allocation4], 4294967168 }
 0x241   :  { %280 = vsyncpa [#allocation3], 1 }
 0x242   :  { %281 = vsyncpa [#allocation6], 1 }
 0x243   :  { %282 = vsyncpa [#allocation9], 1 }
 0x244   :  { %283 = vsyncpa [#allocation4], 1 }

</bundles_post_ra>
